<compile_context>
chip_gen: v7x
topology: tpu7x:2x2x1
jax: 0.10.0
libtpu: 0.0.40
codegen_flags: <defaults>
</compile_context>

<pallas_src>
import jax
import jax.numpy as jnp
from jax.experimental import pallas as pl
from jax.experimental.pallas import tpu as pltpu

HIDDEN = 300          # logical hidden size (PyTorch module)
HP = 384              # padded hidden size (3 * 128 lanes)
MAX_BATCH_TILE = 256  # batch rows per grid step for large-B deployments


def _round_up(v, m):
    return ((v + m - 1) // m) * m


def _batch_tile(B):
    """Pick the batch tile: >=2 grid steps when possible (v7x megacore)."""
    if B <= 8:
        return B
    return min(MAX_BATCH_TILE, max(8, _round_up(pl.cdiv(B, 2), 8)))


def _twin_critic_kernel(xu_ref, w14_ref, b_ref, w25_ref, w36_ref, q_ref):
    """One batch tile of the twin-critic forward.

    xu_ref:  (TB, in_pad) f32 -- concat([x, sg, u]) zero-padded on K.
    w14_ref: (in_pad, 2*HP)  bf16 -- [W1 | W4], zero-padded rows/cols.
    b_ref:   (3, 2*HP) f32 rows: 0 -> [b1 | b4], 1 -> [b2 | b5],
                               2 -> b3 at lane 0, b6 at lane HP.
    w25_ref: (2, HP, HP) bf16 -- [0] = W2, [1] = W5 (zero padded).
    w36_ref: (2, HP)     bf16 -- [0] = W3 row, [1] = W6 row (zero padded).
    """
    xub = xu_ref[...].astype(jnp.bfloat16)

    # ---- fused layer 1 of BOTH towers: single MXU pass, f32 accumulation ----
    h12 = jnp.dot(xub, w14_ref[...], preferred_element_type=jnp.float32)
    h12 = jnp.maximum(h12 + b_ref[0:1, :], 0.0)
    h1 = h12[:, :HP]          # tower-1 activations (lane-aligned slice)
    h2 = h12[:, HP:]          # tower-2 activations

    # ---- layer 2 (separate per tower; do NOT block-diag) ----
    g1 = jnp.maximum(
        jnp.dot(h1.astype(jnp.bfloat16), w25_ref[0],
                preferred_element_type=jnp.float32) + b_ref[1:2, :HP], 0.0)
    g2 = jnp.maximum(
        jnp.dot(h2.astype(jnp.bfloat16), w25_ref[1],
                preferred_element_type=jnp.float32) + b_ref[1:2, HP:], 0.0)

    # ---- layer 3: N=1 "matmul" done as VPU multiply + XLU lane reduce ----
    w3_row = w36_ref[0:1, :].astype(jnp.float32)   # (1, HP)
    w6_row = w36_ref[1:2, :].astype(jnp.float32)
    q1 = jnp.sum(g1 * w3_row, axis=-1, keepdims=True) + b_ref[2:3, 0:1]
    q2 = jnp.sum(g2 * w6_row, axis=-1, keepdims=True) + b_ref[2:3, HP:HP + 1]

    # single (TB, 2) store instead of two lane-masked slice stores
    q_ref[...] = jnp.concatenate([q1, q2], axis=-1).astype(q_ref.dtype)


def controller_critic_forward(x, sg, u, kp):
    """Equivalent of ControllerCritic.forward(x, sg, u) -> (q1, q2)."""
    B = x.shape[0]
    in_pad = kp["w14"].shape[0]

    # Fold torch.cat([x, sg, u], 1) + zero-pad K to the packed slab width.
    xu = jnp.concatenate([x, sg, u], axis=1)
    if xu.shape[1] < in_pad:
        xu = jnp.pad(xu, ((0, 0), (0, in_pad - xu.shape[1])))

    tb = _batch_tile(B)
    grid = (pl.cdiv(B, tb),)

    def resident(shape):
        # full-extent block, constant index map -> stays resident in VMEM
        zeros = (0,) * len(shape)
        return pl.BlockSpec(shape, lambda i, z=zeros: z)

    in_specs = [
        pl.BlockSpec((tb, in_pad), lambda i: (i, 0)),   # xu, batch-tiled rows
        resident(kp["w14"].shape),
        resident(kp["b"].shape),
        resident(kp["w25"].shape),
        resident(kp["w36"].shape),
    ]
    out_spec = pl.BlockSpec((tb, 2), lambda i: (i, 0))

    q = pl.pallas_call(
        _twin_critic_kernel,
        out_shape=jax.ShapeDtypeStruct((B, 2), jnp.float32),
        grid=grid,
        in_specs=in_specs,
        out_specs=out_spec,
        compiler_params=pltpu.CompilerParams(
            dimension_semantics=("parallel",)),
    )(xu, kp["w14"], kp["b"], kp["w25"], kp["w36"])

    return q[:, 0:1], q[:, 1:2]


# ----------------------------------------------------------------------------
# Parameter construction / packing
# ----------------------------------------------------------------------------

def init_params(state_dim, goal_dim, action_dim, key):
    """PyTorch-Linear-style init: U(-1/sqrt(fan_in), 1/sqrt(fan_in)).
    Weights stored as (in_features, out_features), f32 (natural layout)."""
    in_dim = state_dim + goal_dim + action_dim
    fan_ins = {"1": in_dim, "2": HIDDEN, "3": HIDDEN,
               "4": in_dim, "5": HIDDEN, "6": HIDDEN}
    outs = {"1": HIDDEN, "2": HIDDEN, "3": 1,
            "4": HIDDEN, "5": HIDDEN, "6": 1}
    params = {}
    keys = jax.random.split(key, 12)
    for idx, i in enumerate("123456"):
        bound = float(fan_ins[i]) ** -0.5
        params[f"w{i}"] = jax.random.uniform(
            keys[2 * idx], (fan_ins[i], outs[i]), jnp.float32, -bound, bound)
        params[f"b{i}"] = jax.random.uniform(
            keys[2 * idx + 1], (1, outs[i]), jnp.float32, -bound, bound)
    return params


def pack_params(params, state_dim, goal_dim, action_dim):
    """Pad HIDDEN 300->384 with zeros, pack both towers, cast weights to bf16.
    Invariant: all padded weight/bias lanes are exactly zero (ReLU(0)=0 keeps
    the math identical to the unpadded network)."""
    pad_h = HP - HIDDEN
    in_dim = state_dim + goal_dim + action_dim
    in_pad = _round_up(in_dim, 16)   # bf16 sublane-pair friendly K

    def pad_cols(w):      # (in, 300) -> (in, 384)
        return jnp.pad(w, ((0, 0), (0, pad_h)))

    # fused layer-1 slab of both towers: (in_pad, 2*HP)
    w14 = jnp.concatenate([pad_cols(params["w1"]), pad_cols(params["w4"])],
                          axis=1)
    w14 = jnp.pad(w14, ((0, in_pad - in_dim), (0, 0))).astype(jnp.bfloat16)

    def pad_sq(w):        # (300, 300) -> (384, 384)
        return jnp.pad(w, ((0, pad_h), (0, pad_h)))

    w25 = jnp.stack([pad_sq(params["w2"]), pad_sq(params["w5"])]
                    ).astype(jnp.bfloat16)               # (2, HP, HP)

    def row_vec(w):       # (300, 1) -> (1, 384)
        return jnp.pad(w[:, 0], (0, pad_h))[None, :]

    w36 = jnp.concatenate([row_vec(params["w3"]), row_vec(params["w6"])],
                          axis=0).astype(jnp.bfloat16)   # (2, HP)

    b = jnp.zeros((3, 2 * HP), jnp.float32)
    b = b.at[0, :HIDDEN].set(params["b1"][0])
    b = b.at[0, HP:HP + HIDDEN].set(params["b4"][0])
    b = b.at[1, :HIDDEN].set(params["b2"][0])
    b = b.at[1, HP:HP + HIDDEN].set(params["b5"][0])
    b = b.at[2, 0].set(params["b3"][0, 0])
    b = b.at[2, HP].set(params["b6"][0, 0])

    return {"w14": w14, "w25": w25, "w36": w36, "b": b}


def reference_forward(x, sg, u, params):
    """Pure-JAX f32 reference (matches the PyTorch module)."""
    xu = jnp.concatenate([x, sg, u], axis=1)
    h = jnp.maximum(xu @ params["w1"] + params["b1"], 0.0)
    h = jnp.maximum(h @ params["w2"] + params["b2"], 0.0)
    q1 = h @ params["w3"] + params["b3"]
    h2 = jnp.maximum(xu @ params["w4"] + params["b4"], 0.0)
    h2 = jnp.maximum(h2 @ params["w5"] + params["b5"], 0.0)
    q2 = h2 @ params["w6"] + params["b6"]
    return q1, q2


if __name__ == "__main__":
    # Small shapes consistent with the module: batch=2, state=16, goal=8, action=4.
    B, state_dim, goal_dim, action_dim = 2, 16, 8, 4

    key = jax.random.PRNGKey(0)
    kx, kg, ku, kparam = jax.random.split(key, 4)
    x = jax.random.normal(kx, (B, state_dim), jnp.float32)
    sg = jax.random.normal(kg, (B, goal_dim), jnp.float32)
    u = jax.random.normal(ku, (B, action_dim), jnp.float32)

    params = init_params(state_dim, goal_dim, action_dim, kparam)
    packed = pack_params(params, state_dim, goal_dim, action_dim)

    q1, q2 = controller_critic_forward(x, sg, u, packed)
    jax.block_until_ready((q1, q2))

    # Correctness vs f32 reference (tolerance relaxed for bf16 weights).
    r1, r2 = reference_forward(x, sg, u, params)
    assert q1.shape == (B, 1) and q2.shape == (B, 1)
    assert jnp.allclose(q1, r1, atol=5e-2, rtol=5e-2), (q1, r1)
    assert jnp.allclose(q2, r2, atol=5e-2, rtol=5e-2), (q2, r2)

    # Multi-step grid check: exercises the >=2-step parallel batch axis and a
    # partial tail tile (B2=40 -> tb=24, grid=2).
    B2 = 40
    kx2, kg2, ku2 = jax.random.split(jax.random.PRNGKey(1), 3)
    x2 = jax.random.normal(kx2, (B2, state_dim), jnp.float32)
    sg2 = jax.random.normal(kg2, (B2, goal_dim), jnp.float32)
    u2 = jax.random.normal(ku2, (B2, action_dim), jnp.float32)
    p1, p2 = controller_critic_forward(x2, sg2, u2, packed)
    jax.block_until_ready((p1, p2))
    s1, s2 = reference_forward(x2, sg2, u2, params)
    assert p1.shape == (B2, 1) and p2.shape == (B2, 1)
    assert jnp.allclose(p1, s1, atol=5e-2, rtol=5e-2), (p1, s1)
    assert jnp.allclose(p2, s2, atol=5e-2, rtol=5e-2), (p2, s2)

    print("KERNEL_OK")
</pallas_src>

<mosaic_0001>
module attributes {stable_mosaic.version = 11 : i64} {
  func.func @_twin_critic_kernel(%arg0: i32, %arg1: memref<2x32xf32, #tpu.memory_space<vmem>>, %arg2: memref<32x768xbf16, #tpu.memory_space<vmem>>, %arg3: memref<3x768xf32, #tpu.memory_space<vmem>>, %arg4: memref<2x384x384xbf16, #tpu.memory_space<vmem>>, %arg5: memref<2x384xbf16, #tpu.memory_space<vmem>>, %arg6: memref<2x2xf32, #tpu.memory_space<vmem>>) attributes {dimension_semantics = [#tpu.dimension_semantics<parallel>], iteration_bounds = array<i64: 1>, scalar_prefetch = 0 : i64, scratch_operands = 0 : i64, tpu.core_type = #tpu.core_type<tc>, window_params = [{transform_indices = @transform_0, window_bounds = array<i64: 2, 32>}, {pipeline_mode = #tpu.pipeline_mode<synchronous>, transform_indices = @transform_1, window_bounds = array<i64: 32, 768>}, {pipeline_mode = #tpu.pipeline_mode<synchronous>, transform_indices = @transform_2, window_bounds = array<i64: 3, 768>}, {pipeline_mode = #tpu.pipeline_mode<synchronous>, transform_indices = @transform_3, window_bounds = array<i64: 2, 384, 384>}, {pipeline_mode = #tpu.pipeline_mode<synchronous>, transform_indices = @transform_4, window_bounds = array<i64: 2, 384>}, {transform_indices = @transform_5, window_bounds = array<i64: 2, 2>}]} {
    %c0 = arith.constant 0 : index
    %c0_0 = arith.constant 0 : index
    %0 = vector.load %arg1[%c0, %c0_0] : memref<2x32xf32, #tpu.memory_space<vmem>>, vector<2x32xf32>
    %1 = arith.truncf %0 : vector<2x32xf32> to vector<2x32xbf16>
    %c0_1 = arith.constant 0 : index
    %c0_2 = arith.constant 0 : index
    %2 = vector.load %arg2[%c0_1, %c0_2] : memref<32x768xbf16, #tpu.memory_space<vmem>>, vector<32x768xbf16>
    %cst = arith.constant dense<0.000000e+00> : vector<2x768xf32>
    %3 = tpu.matmul %1, %2, %cst {dimension_numbers = #tpu.dot_dimension_numbers<[1], [0], [0], [1], [0, 0, 1, 1], [], []>} : vector<2x32xbf16>, vector<32x768xbf16>, vector<2x768xf32> -> vector<2x768xf32>
    %c0_3 = arith.constant 0 : index
    %c0_4 = arith.constant 0 : index
    %4 = vector.load %arg3[%c0_3, %c0_4] : memref<3x768xf32, #tpu.memory_space<vmem>>, vector<1x768xf32>
    %5 = vector.broadcast %4 : vector<1x768xf32> to vector<2x768xf32>
    %6 = arith.addf %3, %5 : vector<2x768xf32>
    %cst_5 = arith.constant 0.000000e+00 : f32
    %7 = vector.broadcast %cst_5 : f32 to vector<2x768xf32>
    %8 = arith.maximumf %6, %7 : vector<2x768xf32>
    %9 = vector.extract_strided_slice %8 {offsets = [0, 0], sizes = [2, 384], strides = [1, 1]} : vector<2x768xf32> to vector<2x384xf32>
    %10 = vector.extract_strided_slice %8 {offsets = [0, 384], sizes = [2, 384], strides = [1, 1]} : vector<2x768xf32> to vector<2x384xf32>
    %11 = arith.truncf %9 : vector<2x384xf32> to vector<2x384xbf16>
    %c0_6 = arith.constant 0 : index
    %c0_7 = arith.constant 0 : index
    %c0_8 = arith.constant 0 : index
    %12 = vector.load %arg4[%c0_6, %c0_7, %c0_8] : memref<2x384x384xbf16, #tpu.memory_space<vmem>>, vector<1x384x384xbf16>
    %13 = vector.shape_cast %12 : vector<1x384x384xbf16> to vector<384x384xbf16>
    %cst_9 = arith.constant dense<0.000000e+00> : vector<2x384xf32>
    %14 = tpu.matmul %11, %13, %cst_9 {dimension_numbers = #tpu.dot_dimension_numbers<[1], [0], [0], [1], [0, 0, 1, 1], [], []>} : vector<2x384xbf16>, vector<384x384xbf16>, vector<2x384xf32> -> vector<2x384xf32>
    %c1 = arith.constant 1 : index
    %c0_10 = arith.constant 0 : index
    %15 = vector.load %arg3[%c1, %c0_10] : memref<3x768xf32, #tpu.memory_space<vmem>>, vector<1x384xf32>
    %16 = vector.broadcast %15 : vector<1x384xf32> to vector<2x384xf32>
    %17 = arith.addf %14, %16 : vector<2x384xf32>
    %cst_11 = arith.constant 0.000000e+00 : f32
    %18 = vector.broadcast %cst_11 : f32 to vector<2x384xf32>
    %19 = arith.maximumf %17, %18 : vector<2x384xf32>
    %20 = arith.truncf %10 : vector<2x384xf32> to vector<2x384xbf16>
    %c1_12 = arith.constant 1 : index
    %c0_13 = arith.constant 0 : index
    %c0_14 = arith.constant 0 : index
    %21 = vector.load %arg4[%c1_12, %c0_13, %c0_14] : memref<2x384x384xbf16, #tpu.memory_space<vmem>>, vector<1x384x384xbf16>
    %22 = vector.shape_cast %21 : vector<1x384x384xbf16> to vector<384x384xbf16>
    %cst_15 = arith.constant dense<0.000000e+00> : vector<2x384xf32>
    %23 = tpu.matmul %20, %22, %cst_15 {dimension_numbers = #tpu.dot_dimension_numbers<[1], [0], [0], [1], [0, 0, 1, 1], [], []>} : vector<2x384xbf16>, vector<384x384xbf16>, vector<2x384xf32> -> vector<2x384xf32>
    %c1_16 = arith.constant 1 : index
    %c384 = arith.constant 384 : index
    %24 = vector.load %arg3[%c1_16, %c384] : memref<3x768xf32, #tpu.memory_space<vmem>>, vector<1x384xf32>
    %25 = vector.broadcast %24 : vector<1x384xf32> to vector<2x384xf32>
    %26 = arith.addf %23, %25 : vector<2x384xf32>
    %cst_17 = arith.constant 0.000000e+00 : f32
    %27 = vector.broadcast %cst_17 : f32 to vector<2x384xf32>
    %28 = arith.maximumf %26, %27 : vector<2x384xf32>
    %c0_18 = arith.constant 0 : index
    %c0_19 = arith.constant 0 : index
    %29 = vector.load %arg5[%c0_18, %c0_19] : memref<2x384xbf16, #tpu.memory_space<vmem>>, vector<1x384xbf16>
    %30 = arith.extf %29 : vector<1x384xbf16> to vector<1x384xf32>
    %c1_20 = arith.constant 1 : index
    %c0_21 = arith.constant 0 : index
    %31 = vector.load %arg5[%c1_20, %c0_21] : memref<2x384xbf16, #tpu.memory_space<vmem>>, vector<1x384xbf16>
    %32 = arith.extf %31 : vector<1x384xbf16> to vector<1x384xf32>
    %33 = vector.broadcast %30 : vector<1x384xf32> to vector<2x384xf32>
    %34 = arith.mulf %19, %33 : vector<2x384xf32>
    %cst_22 = arith.constant dense<0.000000e+00> : vector<2xf32>
    %35 = vector.multi_reduction <add>, %34, %cst_22 [1] : vector<2x384xf32> to vector<2xf32>
    %36 = vector.shape_cast %35 : vector<2xf32> to vector<2x1xf32>
    %c2 = arith.constant 2 : index
    %c0_23 = arith.constant 0 : index
    %37 = vector.load %arg3[%c2, %c0_23] : memref<3x768xf32, #tpu.memory_space<vmem>>, vector<1x1xf32>
    %38 = vector.broadcast %37 : vector<1x1xf32> to vector<2x1xf32>
    %39 = arith.addf %36, %38 : vector<2x1xf32>
    %40 = vector.broadcast %32 : vector<1x384xf32> to vector<2x384xf32>
    %41 = arith.mulf %28, %40 : vector<2x384xf32>
    %cst_24 = arith.constant dense<0.000000e+00> : vector<2xf32>
    %42 = vector.multi_reduction <add>, %41, %cst_24 [1] : vector<2x384xf32> to vector<2xf32>
    %43 = vector.shape_cast %42 : vector<2xf32> to vector<2x1xf32>
    %c2_25 = arith.constant 2 : index
    %c384_26 = arith.constant 384 : index
    %44 = vector.load %arg3[%c2_25, %c384_26] : memref<3x768xf32, #tpu.memory_space<vmem>>, vector<1x1xf32>
    %45 = vector.broadcast %44 : vector<1x1xf32> to vector<2x1xf32>
    %46 = arith.addf %43, %45 : vector<2x1xf32>
    %47 = tpu.concatenate %39, %46 in 1 : vector<2x1xf32>, vector<2x1xf32> -> vector<2x2xf32>
    %c0_27 = arith.constant 0 : index
    %c0_28 = arith.constant 0 : index
    %48 = vector.load %arg6[%c0_27, %c0_28] : memref<2x2xf32, #tpu.memory_space<vmem>>, vector<2x2xf32>
    tpu.vector_store %arg6[%c0_27, %c0_28], %47 {strides = array<i32>} : memref<2x2xf32, #tpu.memory_space<vmem>>, vector<2x2xf32>,
    return
  }
  func.func @transform_0(%arg0: i32) -> (i32, i32) {
    %c0_i32 = arith.constant 0 : i32
    %c0_i32_0 = arith.constant 0 : i32
    return %arg0, %c0_i32 : i32, i32
  }
  func.func @transform_1(%arg0: i32) -> (i32, i32) {
    %c0_i32 = arith.constant 0 : i32
    %c0_i32_0 = arith.constant 0 : i32
    %c0_i32_1 = arith.constant 0 : i32
    return %c0_i32, %c0_i32_0 : i32, i32
  }
  func.func @transform_2(%arg0: i32) -> (i32, i32) {
    %c0_i32 = arith.constant 0 : i32
    %c0_i32_0 = arith.constant 0 : i32
    %c0_i32_1 = arith.constant 0 : i32
    return %c0_i32, %c0_i32_0 : i32, i32
  }
  func.func @transform_3(%arg0: i32) -> (i32, i32, i32) {
    %c0_i32 = arith.constant 0 : i32
    %c0_i32_0 = arith.constant 0 : i32
    %c0_i32_1 = arith.constant 0 : i32
    %c0_i32_2 = arith.constant 0 : i32
    return %c0_i32, %c0_i32_0, %c0_i32_1 : i32, i32, i32
  }
  func.func @transform_4(%arg0: i32) -> (i32, i32) {
    %c0_i32 = arith.constant 0 : i32
    %c0_i32_0 = arith.constant 0 : i32
    %c0_i32_1 = arith.constant 0 : i32
    return %c0_i32, %c0_i32_0 : i32, i32
  }
  func.func @transform_5(%arg0: i32) -> (i32, i32) {
    %c0_i32 = arith.constant 0 : i32
    %c0_i32_0 = arith.constant 0 : i32
    return %arg0, %c0_i32 : i32, i32
  }
}

</mosaic_0001>

<bundles_post_ra>
// kernel: tpu_custom_call.1
= control target key start
LH: loop header
LB: loop body
LE: loop exit
PB: predicated region body
PF: predicated region fallthrough
CT: control target
= control target key end

     0   :  { %10 = vsyncpa [#allocation3], 0  ;;  %s2578_s0 = inlined_call_operand.hbm [shape: f32[2,32], index: 0, kind: input, shape index: {}]   ;;  %s2579_s1 = inlined_call_operand.hbm [shape: bf16[32,768], index: 1, kind: input, shape index: {}]   ;;  %s2580_s2 = inlined_call_operand.hbm [shape: f32[3,768], index: 2, kind: input, shape index: {}]   ;;  %s2581_s3 = inlined_call_operand.hbm [shape: bf16[2,384,384], index: 3, kind: input, shape index: {}]   ;;  %s2582_s4 = inlined_call_operand.vmem [shape: bf16[2,384], index: 4, kind: input, shape index: {}]   ;;  %s2583_s5 = inlined_call_operand.hbm [shape: f32[2,2], index: 5, kind: output, shape index: {}]  }
   0x1   :  { %11 = vsyncpa [#allocation6], 0 }
   0x2   :  { %12 = vsyncpa [#allocation9], 0 }
   0x3   :  { %13 = vsyncpa [#allocation4], 0  ;;  %s2376_s18 = smov [#allocation5]   ;;  %s2258_s22 = scalar_lea.hbm %s2579_s1, 1536 }
   0x4   :  { %s29_s19 = sshll.u32 %s2376_s18, 4  ;;  %p2259_p0 = scmp.ne.s32.totalorder %s2579_s1, %s2258_s22  ;;  %s30_s19 = int_to_ptr.vmem [resolvable:$true] %s29_s19 }
   0x5   :  { %p2262_p1 = scmp.lt.u32.totalorder %s2258_s22, %s2579_s1 }
   0x7   :  { %p2264_p2 = pnand %p2262_p1, %p2259_p0 }
   0x9   :  { %2267 = shalt.err (!%p2264_p2)
}
   0xa   :  { %s2268_s27 = scalar_lea.vmem %s30_s19, 1536  ;;  %p2273_p4 = scmp.lt.s32.totalorder %s30_s19, %s30_s19 }
   0xb   :  { %p2269_p3 = scmp.ne.s32.totalorder %s30_s19, %s2268_s27  ;;  %p2274_p5 = scmp.lt.s32.totalorder %s2268_s27, %s2268_s27 }
   0xd   :  { %p2275_p6 = por %p2274_p5, %p2273_p4 }
   0xf   :  { %p2276_p7 = pnand %p2275_p6, %p2269_p3 }
  0x11   :  { %2279 = shalt.err (!%p2276_p7)
}
  0x12   :  { %s2377_s28 = smov 384   ;;  %s2378_s29 = smov 24  }
  0x13   :  { %35 = dma.hbm_to_vmem [thread:$0]  %s2579_s1, 1536, %s30_s19, [#allocation6], %s2377_s28, %s2377_s28, %s2378_s29  }
  0x14   :  { %s2379_s7 = smov [#allocation2]   ;;  %s2380_s9 = smov [#allocation7]  }
  0x15   :  { %s20_s8 = sshll.u32 %s2379_s7, 4  ;;  %s42_s10 = sshll.u32 %s2380_s9, 4  ;;  %s21_s8 = int_to_ptr.vmem [resolvable:$true] %s20_s8  ;;  %s43_s10 = int_to_ptr.vmem [resolvable:$true] %s42_s10 }
  0x16   :  { %s2280_s13 = scalar_lea.hbm %s2578_s0, 32 }
  0x17   :  { %p2281_p8 = scmp.ne.s32.totalorder %s2578_s0, %s2280_s13  ;;  %p2284_p9 = scmp.lt.u32.totalorder %s2280_s13, %s2578_s0 }
  0x19   :  { %p2286_p10 = pnand %p2284_p9, %p2281_p8 }
  0x1b   :  { %2289 = shalt.err (!%p2286_p10)
}
  0x1c   :  { %s2290_s1 = scalar_lea.vmem %s21_s8, 32  ;;  %p2295_p12 = scmp.lt.s32.totalorder %s21_s8, %s21_s8 }
  0x1d   :  { %p2291_p11 = scmp.ne.s32.totalorder %s21_s8, %s2290_s1  ;;  %p2296_p13 = scmp.lt.s32.totalorder %s2290_s1, %s2290_s1 }
  0x1f   :  { %p2297_p0 = por %p2296_p13, %p2295_p12 }
  0x21   :  { %p2298_p1 = pnand %p2297_p0, %p2291_p11 }
  0x23   :  { %2301 = shalt.err (!%p2298_p1)
}
  0x24   :  { %23 = dma.hbm_to_vmem [thread:$0]  %s2578_s0, 32, %s21_s8, [#allocation3]  }
  0x25   :  { %s2302_s22 = scalar_lea.hbm %s2580_s2, 384 }
  0x26   :  { %p2303_p2 = scmp.ne.s32.totalorder %s2580_s2, %s2302_s22  ;;  %p2306_p3 = scmp.lt.u32.totalorder %s2302_s22, %s2580_s2 }
  0x28   :  { %p2308_p4 = pnand %p2306_p3, %p2303_p2 }
  0x2a   :  { %2311 = shalt.err (!%p2308_p4)
}
  0x2b   :  { %s2312_s27 = scalar_lea.vmem %s43_s10, 384  ;;  %p2317_p6 = scmp.lt.s32.totalorder %s43_s10, %s43_s10 }
  0x2c   :  { %p2313_p5 = scmp.ne.s32.totalorder %s43_s10, %s2312_s27  ;;  %p2318_p7 = scmp.lt.s32.totalorder %s2312_s27, %s2312_s27 }
  0x2e   :  { %p2319_p8 = por %p2318_p7, %p2317_p6 }
  0x30   :  { %p2320_p9 = pnand %p2319_p8, %p2313_p5 }
  0x32   :  { %2323 = shalt.err (!%p2320_p9)
}
  0x33   :  { %45 = dma.hbm_to_vmem [thread:$0]  %s2580_s2, 384, %s43_s10, [#allocation6]  }
  0x34   :  { %s2381_s29 = smov [#allocation8]   ;;  %s2324_s8 = scalar_lea.hbm %s2581_s3, 18432 }
  0x35   :  { %s51_s30 = sshll.u32 %s2381_s29, 4  ;;  %p2325_p10 = scmp.ne.s32.totalorder %s2581_s3, %s2324_s8  ;;  %s52_s30 = int_to_ptr.vmem [resolvable:$true] %s51_s30 }
  0x36   :  { %p2328_p11 = scmp.lt.u32.totalorder %s2324_s8, %s2581_s3 }
  0x38   :  { %p2330_p12 = pnand %p2328_p11, %p2325_p10 }
  0x3a   :  { %2333 = shalt.err (!%p2330_p12)
}
  0x3b   :  { %s2334_s14 = scalar_lea.vmem %s52_s30, 18432  ;;  %p2339_p0 = scmp.lt.s32.totalorder %s52_s30, %s52_s30 }
  0x3c   :  { %p2335_p13 = scmp.ne.s32.totalorder %s52_s30, %s2334_s14  ;;  %p2340_p1 = scmp.lt.s32.totalorder %s2334_s14, %s2334_s14 }
  0x3e   :  { %p2341_p2 = por %p2340_p1, %p2339_p0 }
  0x40   :  { %p2342_p3 = pnand %p2341_p2, %p2335_p13 }
  0x42   :  { %2345 = shalt.err (!%p2342_p3)
}
  0x43   :  { %s2382_s2 = smov 192   ;;  %s2383_s10 = smov 12  }
  0x44   :  { %57 = dma.hbm_to_vmem [thread:$0]  %s2581_s3, 18432, %s52_s30, [#allocation9], %s2382_s2, %s2382_s2, %s2383_s10  }
  0x45   :  { %2368 = dma.done.wait [#allocation3], 32  }
  0x46   :  { %2369 = vsyncadd [#allocation3], 4294967264 }
  0x47   :  { %2370 = dma.done.wait [#allocation6], 1920  }
  0x48   :  { %2371 = vsyncadd [#allocation6], 4294965376 }
  0x49   :  { %2372 = dma.done.wait [#allocation9], 18432  }
  0x4a   :  { %2373 = vsyncadd [#allocation9], 4294948864  ;;  %v2384_v0 = vmov 0   ;;  %v2048_v1 = vld [vmem:[#allocation5 + $0x4] ss:$24 sps:$4 sm:$0xff]   ;;  %vm179_vm0 = vcmask 261120  }
  0x4b   :  { %215 = vmatprep.mubr.bf16.mxu0 %v2384_v0  ;;  %256 = vmatprep.mubr.bf16.mxu1 %v2384_v0  ;;  %v2050_v2 = vld [vmem:[#allocation5] ss:$24 sps:$4 sm:$0xff]   ;;  %v2051_v3 = vld [vmem:[#allocation5 + $0x34] ss:$24 sps:$4 sm:$0xff]   ;;  %v2053_v4 = vld [vmem:[#allocation5 + $0x30] ss:$24 sps:$4 sm:$0xff]  }
  0x4c   :  { %183 = vmatprep.subr.bf16.mxu0 %v2048_v1  ;;  %v73_v5 = vld [vmem:[#allocation2] sm:$0x3]  ;;  %v2054_v6 = vld [vmem:[#allocation5 + $0xc] ss:$24 sps:$4 sm:$0xff]   ;;  %v2056_v7 = vld [vmem:[#allocation5 + $0x8] ss:$24 sps:$4 sm:$0xff]  }
  0x4d   :  { %184 = vmatpush1.bf16.msra.mxu0 %v2050_v2  ;;  %224 = vmatprep.subr.bf16.mxu1 %v2054_v6  ;;  %v2057_v8 = vld [vmem:[#allocation5 + $0x3c] ss:$24 sps:$4 sm:$0xff]   ;;  %v74_v9 = vpack.c.bf16 %v73_v5, %v73_v5  ;;  %v2059_v10 = vld [vmem:[#allocation5 + $0x38] ss:$24 sps:$4 sm:$0xff]   ;;  %v2075_v22 = vld [vmem:[#allocation8 + $0x48] ss:$12 sps:$4 sm:$0xff]   ;;  %v89_v2 = vlaneseq }
  0x4e   :  { %185 = vmatprep.subr.bf16.mxu0 %v2051_v3  ;;  %225 = vmatpush1.bf16.msra.mxu1 %v2056_v7  ;;  %v2062_v11 = vld [vmem:[#allocation5 + $0x14] ss:$24 sps:$4 sm:$0xff]   ;;  %v2060_v12 = vld [vmem:[#allocation5 + $0x10] ss:$24 sps:$4 sm:$0xff]   ;;  %v2065_v13 = vld [vmem:[#allocation5 + $0x44] ss:$24 sps:$4 sm:$0xff]  }
  0x4f   :  { %226 = vmatprep.subr.bf16.mxu1 %v2057_v8  ;;  %v2068_v14 = vld [vmem:[#allocation8 + $0x4] ss:$12 sps:$4 sm:$0xff]   ;;  %v2063_v15 = vld [vmem:[#allocation5 + $0x40] ss:$24 sps:$4 sm:$0xff]   ;;  %v2077_v21 = vld [vmem:[#allocation8 + $0x4c] ss:$12 sps:$4 sm:$0xff]  }
  0x50   :  { %v2066_v16 = vld [vmem:[#allocation8] ss:$12 sps:$4 sm:$0xff]   ;;  %v2071_v17 = vld [vmem:[#allocation8 + $0x1c] ss:$12 sps:$4 sm:$0xff]   ;;  %v2069_v18 = vld [vmem:[#allocation8 + $0x18] ss:$12 sps:$4 sm:$0xff]  }
  0x51   :  { %186 = vmatpush1.bf16.msra.mxu0 %v2053_v4  ;;  %v2074_v19 = vld [vmem:[#allocation8 + $0x34] ss:$12 sps:$4 sm:$0xff]   ;;  %v2072_v20 = vld [vmem:[#allocation8 + $0x30] ss:$12 sps:$4 sm:$0xff]   ;;  %v2103_v30 = vld [vmem:[#allocation8 + $0xf8] ss:$12 sps:$4 sm:$0xff]  }
  0x52   :  { %265 = vmatprep.subr.bf16.mxu0 %v2062_v11  ;;  %227 = vmatpush1.bf16.msra.mxu1 %v2059_v10  ;;  %v2093_v23 = vld [vmem:[#allocation8 + $0xc8] ss:$12 sps:$4 sm:$0xff]   ;;  %v2080_v25 = vld [vmem:[#allocation8 + $0x64] ss:$12 sps:$4 sm:$0xff]   ;;  %v2098_v26 = vld [vmem:[#allocation8 + $0xe0] ss:$12 sps:$4 sm:$0xff]  }
  0x53   :  { %813 = vmatprep.subr.bf16.mxu1 %v2068_v14  ;;  %v2094_v24 = vld [vmem:[#allocation8 + $0x8] ss:$12 sps:$4 sm:$0xff]   ;;  %v2099_v27 = vld [vmem:[#allocation8 + $0x20] ss:$12 sps:$4 sm:$0xff]   ;;  %v2104_v31 = vld [vmem:[#allocation8 + $0x38] ss:$12 sps:$4 sm:$0xff]  }
  0x54   :  { %1772 = vmatmul.mubr.msk.bf16.vlgmr.msra.gmra.mrb[0].mxu0 %vm179_vm0, %v74_v9  ;;  %v2078_v28 = vld [vmem:[#allocation8 + $0x60] ss:$12 sps:$4 sm:$0xff]   ;;  %v2083_v29 = vld [vmem:[#allocation8 + $0x7c] ss:$12 sps:$4 sm:$0xff]   ;;  %v2081_v32 = vld [vmem:[#allocation8 + $0x78] ss:$12 sps:$4 sm:$0xff]  }
  0x55   :  { %266 = vmatpush1.bf16.msra.mxu0 %v2060_v12  ;;  %297 = vmatprep.mubr.bf16.mxu0 %v2384_v0  ;;  %v2086_v33 = vld [vmem:[#allocation8 + $0x94] ss:$12 sps:$4 sm:$0xff]   ;;  %v2108_v34 = vld [vmem:[#allocation8 + $0x110] ss:$12 sps:$4 sm:$0xff]   ;;  %v2089_v38 = vld [vmem:[#allocation8 + $0xac] ss:$12 sps:$4 sm:$0xff]  }
  0x56   :  { %267 = vmatprep.subr.bf16.mxu0 %v2065_v13  ;;  %1773 = vmatmul.mubr.msk.bf16.vlgmr.msra.gmra.mrb[0].mxu1 %vm179_vm0, %v74_v9  ;;  %v2109_v35 = vld [vmem:[#allocation8 + $0x50] ss:$12 sps:$4 sm:$0xff]   ;;  %v2113_v37 = vld [vmem:[#allocation8 + $0x128] ss:$12 sps:$4 sm:$0xff]   ;;  %v2118_v41 = vld [vmem:[#allocation8 + $0x140] ss:$12 sps:$4 sm:$0xff]  }
  0x57   :  { %814 = vmatpush1.bf16.msra.mxu1 %v2066_v16  ;;  %v2084_v36 = vld [vmem:[#allocation8 + $0x90] ss:$12 sps:$4 sm:$0xff]   ;;  %v2087_v39 = vld [vmem:[#allocation8 + $0xa8] ss:$12 sps:$4 sm:$0xff]   ;;  %v2119_v43 = vld [vmem:[#allocation8 + $0x80] ss:$12 sps:$4 sm:$0xff]  }
  0x58   :  { %815 = vmatprep.subr.bf16.mxu1 %v2071_v17  ;;  %v2114_v40 = vld [vmem:[#allocation8 + $0x68] ss:$12 sps:$4 sm:$0xff]   ;;  %v2092_v42 = vld [vmem:[#allocation8 + $0xc4] ss:$12 sps:$4 sm:$0xff]   ;;  %v2090_v44 = vld [vmem:[#allocation8 + $0xc0] ss:$12 sps:$4 sm:$0xff]  }
  0x59   :  { %268 = vmatpush1.bf16.msra.mxu0 %v2063_v15  ;;  %v2097_v45 = vld [vmem:[#allocation8 + $0xdc] ss:$12 sps:$4 sm:$0xff]   ;;  %v2095_v46 = vld [vmem:[#allocation8 + $0xd8] ss:$12 sps:$4 sm:$0xff]   ;;  %v2102_v47 = vld [vmem:[#allocation8 + $0xf4] ss:$12 sps:$4 sm:$0xff]  }
  0x5a   :  { %1921 = vmatprep.subr.bf16.mxu0 %v2093_v23  ;;  %v2100_v48 = vld [vmem:[#allocation8 + $0xf0] ss:$12 sps:$4 sm:$0xff]   ;;  %v2107_v49 = vld [vmem:[#allocation8 + $0x10c] ss:$12 sps:$4 sm:$0xff]   ;;  %v2105_v50 = vld [vmem:[#allocation8 + $0x108] ss:$12 sps:$4 sm:$0xff]  }
  0x5b   :  { %816 = vmatpush1.bf16.msra.mxu1 %v2069_v18  ;;  %v2112_v51 = vld [vmem:[#allocation8 + $0x124] ss:$12 sps:$4 sm:$0xff]   ;;  %v2110_v52 = vld [vmem:[#allocation8 + $0x120] ss:$12 sps:$4 sm:$0xff]   ;;  %v2117_v53 = vld [vmem:[#allocation8 + $0x13c] ss:$12 sps:$4 sm:$0xff]  }
  0x5c   :  { %1774 = vmatmul.mubr.msk.bf16.vlgmr.msra.gmra.mrb[4].mxu0 %vm179_vm0, %v74_v9  ;;  %817 = vmatprep.subr.bf16.mxu1 %v2074_v19  ;;  %v2115_v54 = vld [vmem:[#allocation8 + $0x138] ss:$12 sps:$4 sm:$0xff]   ;;  %v2122_v55 = vld [vmem:[#allocation8 + $0x154] ss:$12 sps:$4 sm:$0xff]   ;;  %v2120_v57 = vld [vmem:[#allocation8 + $0x150] ss:$12 sps:$4 sm:$0xff]  }
  0x5d   :  { %1922 = vmatpush3.bf16.msra.mxu0 %v2094_v24  ;;  %v2123_v56 = vld [vmem:[#allocation8 + $0x158] ss:$12 sps:$4 sm:$0xff]   ;;  %v2128_v60 = vld [vmem:[#allocation8 + $0x170] ss:$12 sps:$4 sm:$0xff]   ;;  %v2125_v61 = vld [vmem:[#allocation8 + $0x168] ss:$12 sps:$4 sm:$0xff]  }
  0x5e   :  { %1923 = vmatprep.subr.bf16.mxu0 %v2098_v26  ;;  %v2124_v58 = vld [vmem:[#allocation8 + $0x98] ss:$12 sps:$4 sm:$0xff]   ;;  %v2129_v62 = vld [vmem:[#allocation8 + $0xb0] ss:$12 sps:$4 sm:$0xff]   ;;  %v2385_v1 = vmov 0.0   ;;  %v2474_v3 = vshrl.u32 %v89_v2, 7 }
  0x5f   :  { %818 = vmatpush1.bf16.msra.mxu1 %v2072_v20  ;;  %v2127_v59 = vld [vmem:[#allocation8 + $0x16c] ss:$12 sps:$4 sm:$0xff]   ;;  %v2132_v63 = vld [vmem:[#allocation8 + $0x184] ss:$12 sps:$4 sm:$0xff]   ;;  %vm2386_vm1 = vmmov 0   ;;  %vm1678_vm2 = vcmask 1041408  }
  0x60   :  { %819 = vmatprep.subr.bf16.mxu1 %v2077_v21  ;;  %v2477_v4 = vsub.s32 0, %v2474_v3  ;;  %v2479_v5 = vld [vmem:[#allocation7] ss:$4 sm:$0x3f]  ;;  %v2482_v6 = vsub.s32 1, %v2474_v3  ;;  %s2388_s1 = smov [#allocation10]  }
  0x61   :  { %1924 = vmatpush3.bf16.msra.mxu0 %v2099_v27  ;;  %v2130_v21 = vld [vmem:[#allocation8 + $0x180] ss:$12 sps:$4 sm:$0xff]   ;;  %s1749_s18 = sshll.u32 %s2388_s1, 4  ;;  %vm1739_vm3 = vcmask 7168   ;;  %vm1741_vm4 = vcmask 9216   ;;  %s1750_s18 = int_to_ptr.vmem [resolvable:$true] %s1749_s18 }
  0x62   :  { %1925 = vmatprep.subr.bf16.mxu0 %v2103_v30  ;;  %v92_v7 = vrot.slane %v2479_v5, %v2477_v4  ;;  %v96_v8 = vrot.slane %v2479_v5, %v2482_v6  ;;  %v2170_v2 = vld [vmem:[#allocation8 + $0x320] ss:$12 sps:$4 sm:$0xff]   ;;  %s2346_s19 = scalar_lea.vmem %s1750_s18, 32  ;;  %p2351_p5 = scmp.lt.s32.totalorder %s1750_s18, %s1750_s18 }
  0x63   :  { %820 = vmatpush1.bf16.msra.mxu1 %v2075_v22  ;;  %v2133_v22 = vld [vmem:[#allocation8 + $0x188] ss:$12 sps:$4 sm:$0xff]   ;;  %p2347_p4 = scmp.ne.s32.totalorder %s1750_s18, %s2346_s19  ;;  %p2352_p6 = scmp.lt.s32.totalorder %s2346_s19, %s2346_s19 }
  0x64   :  { %821 = vmatprep.subr.bf16.mxu1 %v2080_v25  ;;  %v2136_v25 = vld [vmem:[#allocation8 + $0x19c] ss:$12 sps:$4 sm:$0xff]  }
  0x65   :  { %1926 = vmatpush3.bf16.msra.mxu0 %v2104_v31  ;;  %v2140_v31 = vld [vmem:[#allocation8 + $0x1b4] ss:$12 sps:$4 sm:$0xff]   ;;  %p2353_p7 = por %p2352_p6, %p2351_p5 }
  0x66   :  { %1927 = vmatprep.subr.bf16.mxu0 %v2108_v34  ;;  %v2141_v34 = vld [vmem:[#allocation8 + $0x1b8] ss:$12 sps:$4 sm:$0xff]  }
  0x67   :  { %822 = vmatpush1.bf16.msra.mxu1 %v2078_v28  ;;  %v2134_v28 = vld [vmem:[#allocation8 + $0x198] ss:$12 sps:$4 sm:$0xff]   ;;  %p2354_p8 = pnand %p2353_p7, %p2347_p4 }
  0x68   :  { %823 = vmatprep.subr.bf16.mxu1 %v2083_v29  ;;  %v2137_v29 = vld [vmem:[#allocation8 + $0x1a0] ss:$12 sps:$4 sm:$0xff]  }
  0x69   :  { %1928 = vmatpush3.bf16.msra.mxu0 %v2109_v35  ;;  %v2144_v35 = vld [vmem:[#allocation8 + $0x1cc] ss:$12 sps:$4 sm:$0xff]  }
  0x6a   :  { %1929 = vmatprep.subr.bf16.mxu0 %v2113_v37  ;;  %v2145_v37 = vld [vmem:[#allocation8 + $0x1d0] ss:$12 sps:$4 sm:$0xff]  }
  0x6b   :  { %824 = vmatpush1.bf16.msra.mxu1 %v2081_v32 }
  0x6c   :  { %825 = vmatprep.subr.bf16.mxu1 %v2086_v33  ;;  %v2138_v33 = vld [vmem:[#allocation8 + $0x1b0] ss:$12 sps:$4 sm:$0xff]  }
  0x6d   :  { %1930 = vmatpush3.bf16.msra.mxu0 %v2114_v40  ;;  %v2146_v40 = vld [vmem:[#allocation8 + $0x1e0] ss:$12 sps:$4 sm:$0xff]  }
  0x6e   :  { %1931 = vmatprep.subr.bf16.mxu0 %v2118_v41  ;;  %v2149_v41 = vld [vmem:[#allocation8 + $0x1e8] ss:$12 sps:$4 sm:$0xff]  }
  0x6f   :  { %826 = vmatpush1.bf16.msra.mxu1 %v2084_v36  ;;  %v2142_v36 = vld [vmem:[#allocation8 + $0x1c8] ss:$12 sps:$4 sm:$0xff]  }
  0x70   :  { %827 = vmatprep.subr.bf16.mxu1 %v2089_v38  ;;  %v2148_v38 = vld [vmem:[#allocation8 + $0x1e4] ss:$12 sps:$4 sm:$0xff]  }
  0x71   :  { %1932 = vmatpush3.bf16.msra.mxu0 %v2119_v43  ;;  %v107_v43 = vsub.s32 4, %v2474_v3 }
  0x72   :  { %1933 = vmatprep.subr.bf16.mxu0 %v2123_v56  ;;  %v2161_v56 = vld [vmem:[#allocation8 + $0x230] ss:$12 sps:$4 sm:$0xff]  }
  0x73   :  { %828 = vmatpush1.bf16.msra.mxu1 %v2087_v39  ;;  %v2499_v39 = vsub.s32 2, %v2474_v3 }
  0x74   :  { %829 = vmatprep.subr.bf16.mxu1 %v2092_v42  ;;  %v2152_v42 = vld [vmem:[#allocation8 + $0x1fc] ss:$12 sps:$4 sm:$0xff]  }
  0x75   :  { %1934 = vmatpush3.bf16.msra.mxu0 %v2124_v58  ;;  %v2165_v58 = vld [vmem:[#allocation8 + $0x308] ss:$12 sps:$4 sm:$0xff]  }
  0x76   :  { %1935 = vmatprep.subr.bf16.mxu0 %v2128_v60 }
  0x77   :  { %830 = vmatpush1.bf16.msra.mxu1 %v2090_v44  ;;  %v100_v44 = vrot.slane %v2479_v5, %v2499_v39 }
  0x78   :  { %831 = vmatprep.subr.bf16.mxu1 %v2097_v45  ;;  %v2150_v45 = vld [vmem:[#allocation8 + $0x1f8] ss:$12 sps:$4 sm:$0xff]  }
  0x79   :  { %1936 = vmatpush3.bf16.msra.mxu0 %v2129_v62  ;;  %v2166_v62 = vld [vmem:[#allocation8 + $0x248] ss:$12 sps:$4 sm:$0xff]  }
  0x7a   :  { %1983 = vmatprep.subr.bf16.mxu0 %v2385_v1 }
  0x7b   :  { %832 = vmatpush1.bf16.msra.mxu1 %v2095_v46  ;;  %v2153_v46 = vld [vmem:[#allocation8 + $0x200] ss:$12 sps:$4 sm:$0xff]  }
  0x7c   :  { %833 = vmatprep.subr.bf16.mxu1 %v2102_v47  ;;  %v2156_v47 = vld [vmem:[#allocation8 + $0x214] ss:$12 sps:$4 sm:$0xff]  }
  0x7f   :  { %834 = vmatpush1.bf16.msra.mxu1 %v2100_v48  ;;  %v108_v48 = vrot.slane %v2479_v5, %v107_v43 }
  0x80   :  { %835 = vmatprep.subr.bf16.mxu1 %v2107_v49 }
  0x83   :  { %836 = vmatpush1.bf16.msra.mxu1 %v2105_v50  ;;  %v2154_v50 = vld [vmem:[#allocation8 + $0x210] ss:$12 sps:$4 sm:$0xff]  }
  0x84   :  { %837 = vmatprep.subr.bf16.mxu1 %v2112_v51  ;;  %v2157_v51 = vld [vmem:[#allocation8 + $0x218] ss:$12 sps:$4 sm:$0xff]  }
  0x87   :  { %838 = vmatpush1.bf16.msra.mxu1 %v2110_v52  ;;  %v2160_v52 = vld [vmem:[#allocation8 + $0x22c] ss:$12 sps:$4 sm:$0xff]  }
  0x88   :  { %839 = vmatprep.subr.bf16.mxu1 %v2117_v53 }
  0x8b   :  { %840 = vmatpush1.bf16.msra.mxu1 %v2115_v54 }
  0x8c   :  { %841 = vmatprep.subr.bf16.mxu1 %v2122_v55  ;;  %v2158_v55 = vld [vmem:[#allocation8 + $0x228] ss:$12 sps:$4 sm:$0xff]  }
  0x8f   :  { %842 = vmatpush1.bf16.msra.mxu1 %v2120_v57  ;;  %v2164_v57 = vld [vmem:[#allocation8 + $0x244] ss:$12 sps:$4 sm:$0xff]  }
  0x90   :  { %843 = vmatprep.subr.bf16.mxu1 %v2127_v59 }
  0x93   :  { %844 = vmatpush1.bf16.msra.mxu1 %v2125_v61  ;;  %v2162_v61 = vld [vmem:[#allocation8 + $0x240] ss:$12 sps:$4 sm:$0xff]  }
  0x94   :  { %854 = vmatprep.subr.bf16.mxu1 %v2132_v63  ;;  %v2169_v63 = vld [vmem:[#allocation8 + $0x25c] ss:$12 sps:$4 sm:$0xff]  }
 0x127   :  { %v217_v9 = vpop.f32.mrb[0].mxu0 }
 0x128   :  { %v218_v10 = vadd.f32 %v217_v9, %v92_v7  ;;  %v219_v11 = vpop.f32.mrb[1].mxu0  ;;  %v2171_v9 = vld [vmem:[#allocation8 + $0x260] ss:$12 sps:$4 sm:$0xff]  }
 0x129   :  { %v220_v12 = vadd.f32 %v219_v11, %v96_v8  ;;  %v221_v13 = vpop.f32.mrb[2].mxu0  ;;  %v258_v16 = vpop.f32.mrb[0].mxu1  ;;  %v2167_v8 = vld [vmem:[#allocation8 + $0x258] ss:$12 sps:$4 sm:$0xff]  }
 0x12a   :  { %v306_v14 = vmax.f32 %v218_v10, 0.0  ;;  %v222_v15 = vpop.f32.mrb[3].mxu0  ;;  %v2488_v18 = vpop.f32.mrb[1].mxu1  ;;  %v259_v49 = vadd.f32 %v258_v16, %v100_v44  ;;  %v2174_v10 = vld [vmem:[#allocation8 + $0x274] ss:$12 sps:$4 sm:$0xff]  }
 0x12b   :  { %v307_v17 = vmax.f32 %v220_v12, 0.0  ;;  %v262_v19 = vpop.f32.mrb[2].mxu1  ;;  %v2175_v11 = vld [vmem:[#allocation8 + $0x338] ss:$12 sps:$4 sm:$0xff]   ;;  %v2172_v12 = vld [vmem:[#allocation8 + $0x270] ss:$12 sps:$4 sm:$0xff]  }
 0x12c   :  { %v263_v23 = vpop.f32.mrb[3].mxu1  ;;  %v312_v24 = vpack.c.bf16 %v306_v14, %v306_v14  ;;  %v308_v54 = vmax.f32 %v259_v49, 0.0  ;;  %v2176_v13 = vld [vmem:[#allocation8 + $0x278] ss:$12 sps:$4 sm:$0xff]   ;;  %v2180_v15 = vld [vmem:[#allocation8 + $0x350] ss:$12 sps:$4 sm:$0xff]  }
 0x12d   :  { %v313_v20 = vpack.c.bf16 %v307_v17, %v307_v17  ;;  %v2179_v14 = vld [vmem:[#allocation8 + $0x28c] ss:$12 sps:$4 sm:$0xff]   ;;  %v2177_v16 = vld [vmem:[#allocation8 + $0x288] ss:$12 sps:$4 sm:$0xff]   ;;  %v2181_v17 = vld [vmem:[#allocation8 + $0x290] ss:$12 sps:$4 sm:$0xff]  }
 0x12e   :  { %v314_v60 = vpack.c.bf16 %v308_v54, %v308_v54  ;;  %v2184_v19 = vld [vmem:[#allocation8 + $0x2a4] ss:$12 sps:$4 sm:$0xff]   ;;  %v103_v23 = vsub.s32 3, %v2474_v3  ;;  %v2205_v44 = vld [vmem:[#allocation8 + $0x3c8] ss:$12 sps:$4 sm:$0xff]  }
 0x12f   :  { %845 = vmatprep.mubr.bf16.mxu1 %v313_v20  ;;  %927 = vmatprep.mubr.bf16.mxu0 %v313_v20  ;;  %v299_v26 = vpop.f32.mrb[4].mxu0  ;;  %v2185_v20 = vld [vmem:[#allocation8 + $0x368] ss:$12 sps:$4 sm:$0xff]   ;;  %v2210_v49 = vld [vmem:[#allocation8 + $0x330] ss:$12 sps:$4 sm:$0xff]  }
 0x130   :  { %846 = vmatmul.mubr.bf16.vlgmr.msra.gmra.mrb[4].mxu1 %v312_v24  ;;  %928 = vmatmul.mubr.bf16.vlgmr.msra.gmra.mrb[8].mxu0 %v312_v24  ;;  %v2490_v27 = vpop.f32.mrb[5].mxu0  ;;  %v300_v53 = vadd.f32 %v299_v26, %v108_v48  ;;  %v2189_v24 = vld [vmem:[#allocation8 + $0x2bc] ss:$12 sps:$4 sm:$0xff]   ;;  %v2187_v26 = vld [vmem:[#allocation8 + $0x2b8] ss:$12 sps:$4 sm:$0xff]  }
 0x131   :  { %855 = vmatpush1.bf16.msra.mxu1 %v2130_v21  ;;  %1984 = vmatpush3.bf16.msra.mxu0 %v2133_v22  ;;  %v303_v30 = vpop.f32.mrb[6].mxu0  ;;  %v2182_v21 = vld [vmem:[#allocation8 + $0x2a0] ss:$12 sps:$4 sm:$0xff]   ;;  %v2186_v22 = vld [vmem:[#allocation8 + $0x2a8] ss:$12 sps:$4 sm:$0xff]  }
 0x132   :  { %856 = vmatprep.subr.bf16.mxu1 %v2136_v25  ;;  %1985 = vmatprep.subr.bf16.mxu0 %v2385_v1  ;;  %v304_v32 = vpop.f32.mrb[7].mxu0  ;;  %v310_v59 = vmax.f32 %v300_v53, 0.0  ;;  %v2190_v25 = vld [vmem:[#allocation8 + $0x380] ss:$12 sps:$4 sm:$0xff]   ;;  %v2217_v53 = vld [vmem:[#allocation8 + $0x410] ss:$12 sps:$4 sm:$0xff]  }
 0x133   :  { %886 = vmatprep.mubr.bf16.mxu1 %v2384_v0  ;;  %1999 = vmatprep.mubr.msk.bf16.mxu0 %vm2386_vm1, %v2385_v1  ;;  %v2194_v30 = vld [vmem:[#allocation8 + $0x2d4] ss:$12 sps:$4 sm:$0xff]   ;;  %v2192_v32 = vld [vmem:[#allocation8 + $0x2d0] ss:$12 sps:$4 sm:$0xff]  }
 0x134   :  { %v979_v7 = vpack.c.bf16 %v310_v59, %v310_v59  ;;  %v2212_v48 = vld [vmem:[#allocation8 + $0x334] ss:$12 sps:$4 sm:$0xff]   ;;  %v2220_v54 = vld [vmem:[#allocation8 + $0x364] ss:$12 sps:$4 sm:$0xff]  }
 0x135   :  { %857 = vmatpush1.bf16.msra.mxu1 %v2134_v28  ;;  %1986 = vmatpush3.bf16.msra.mxu0 %v2137_v29  ;;  %v2191_v28 = vld [vmem:[#allocation8 + $0x2c0] ss:$12 sps:$4 sm:$0xff]   ;;  %v104_v29 = vrot.slane %v2479_v5, %v103_v23 }
 0x136   :  { %858 = vmatprep.subr.bf16.mxu1 %v2140_v31  ;;  %1987 = vmatprep.subr.bf16.mxu0 %v2385_v1  ;;  %v2195_v31 = vld [vmem:[#allocation8 + $0x398] ss:$12 sps:$4 sm:$0xff]  }
 0x139   :  { %859 = vmatpush1.bf16.msra.mxu1 %v2138_v33  ;;  %1988 = vmatpush3.bf16.msra.mxu0 %v2141_v34  ;;  %v2196_v33 = vld [vmem:[#allocation8 + $0x2d8] ss:$12 sps:$4 sm:$0xff]   ;;  %v261_v34 = vadd.f32 %v2488_v18, %v104_v29  ;;  %v2208_v18 = vld [vmem:[#allocation8 + $0x31c] ss:$12 sps:$4 sm:$0xff]  }
 0x13a   :  { %860 = vmatprep.subr.bf16.mxu1 %v2144_v35  ;;  %1989 = vmatprep.subr.bf16.mxu0 %v2385_v1  ;;  %v2199_v35 = vld [vmem:[#allocation8 + $0x2ec] ss:$12 sps:$4 sm:$0xff]  }
 0x13d   :  { %861 = vmatpush1.bf16.msra.mxu1 %v2142_v36  ;;  %1990 = vmatpush3.bf16.msra.mxu0 %v2145_v37  ;;  %v2200_v36 = vld [vmem:[#allocation8 + $0x3b0] ss:$12 sps:$4 sm:$0xff]   ;;  %v2197_v37 = vld [vmem:[#allocation8 + $0x2e8] ss:$12 sps:$4 sm:$0xff]  }
 0x13e   :  { %862 = vmatprep.subr.bf16.mxu1 %v2148_v38  ;;  %1991 = vmatprep.subr.bf16.mxu0 %v2385_v1  ;;  %v2201_v38 = vld [vmem:[#allocation8 + $0x2f0] ss:$12 sps:$4 sm:$0xff]  }
 0x141   :  { %863 = vmatpush1.bf16.msra.mxu1 %v2146_v40  ;;  %1992 = vmatpush3.bf16.msra.mxu0 %v2149_v41  ;;  %v309_v40 = vmax.f32 %v261_v34, 0.0  ;;  %v2204_v41 = vld [vmem:[#allocation8 + $0x304] ss:$12 sps:$4 sm:$0xff]  }
 0x142   :  { %864 = vmatprep.subr.bf16.mxu1 %v2152_v42  ;;  %1993 = vmatprep.subr.bf16.mxu0 %v2385_v1  ;;  %v2202_v42 = vld [vmem:[#allocation8 + $0x300] ss:$12 sps:$4 sm:$0xff]  }
 0x143   :  { %v412_v34 = vld [vmem:[#allocation7 + $0x1] ss:$4 sm:$0x7] }
 0x145   :  { %865 = vmatpush1.bf16.msra.mxu1 %v2150_v45  ;;  %1994 = vmatpush3.bf16.msra.mxu0 %v2153_v46  ;;  %v2516_v45 = vpack.c.bf16 %v309_v40, %v309_v40  ;;  %v2206_v46 = vld [vmem:[#allocation8 + $0x318] ss:$12 sps:$4 sm:$0xff]  }
 0x146   :  { %866 = vmatprep.subr.bf16.mxu1 %v2156_v47  ;;  %1995 = vmatprep.subr.bf16.mxu0 %v2385_v1  ;;  %v2209_v47 = vld [vmem:[#allocation8 + $0x3e0] ss:$12 sps:$4 sm:$0xff]  }
 0x149   :  { %867 = vmatpush1.bf16.msra.mxu1 %v2154_v50  ;;  %1996 = vmatpush3.bf16.msra.mxu0 %v2157_v51  ;;  %v2213_v50 = vld [vmem:[#allocation8 + $0x3f8] ss:$12 sps:$4 sm:$0xff]  }
 0x14a   :  { %868 = vmatprep.subr.bf16.mxu1 %v2160_v52  ;;  %1997 = vmatprep.subr.bf16.mxu0 %v2385_v1  ;;  %v2216_v51 = vld [vmem:[#allocation8 + $0x34c] ss:$12 sps:$4 sm:$0xff]   ;;  %v2214_v52 = vld [vmem:[#allocation8 + $0x348] ss:$12 sps:$4 sm:$0xff]  }
 0x14d   :  { %869 = vmatpush1.bf16.msra.mxu1 %v2158_v55  ;;  %1998 = vmatpush3.bf16.msra.mxu0 %v2161_v56  ;;  %v111_v55 = vsub.s32 5, %v2474_v3  ;;  %v2218_v56 = vld [vmem:[#allocation8 + $0x360] ss:$12 sps:$4 sm:$0xff]  }
 0x14e   :  { %1480 = vmatprep.subr.bf16.mxu0 %v2164_v57  ;;  %1952 = vmatprep.subr.bf16.mxu1 %v2165_v58  ;;  %v2221_v57 = vld [vmem:[#allocation8 + $0x428] ss:$12 sps:$4 sm:$0xff]  }
 0x14f   :  { %v2224_v58 = vld [vmem:[#allocation8 + $0x37c] ss:$12 sps:$4 sm:$0xff]   ;;  %v112_v59 = vrot.slane %v2479_v5, %v111_v55 }
 0x150   :  { %887 = vmatmul.mubr.bf16.vlgmr.msra.gmra.mrb[4].mxu1 %v314_v60  ;;  %2000 = vmatmul.mubr.bf16.vlgmr.msra.gmra.mrb[12].mxu0 %v314_v60  ;;  %v2222_v60 = vld [vmem:[#allocation8 + $0x378] ss:$12 sps:$4 sm:$0xff]   ;;  %v2230_v5 = vld [vmem:[#allocation8 + $0x3a8] ss:$12 sps:$4 sm:$0xff]  }
 0x151   :  { %1481 = vmatpush1.bf16.msra.mxu0 %v2162_v61  ;;  %1953 = vmatpush3.bf16.msra.mxu1 %v2166_v62  ;;  %v2225_v61 = vld [vmem:[#allocation8 + $0x440] ss:$12 sps:$4 sm:$0xff]  }
 0x152   :  { %1482 = vmatprep.subr.bf16.mxu0 %v2169_v63  ;;  %1954 = vmatprep.subr.bf16.mxu1 %v2170_v2  ;;  %v2228_v62 = vld [vmem:[#allocation8 + $0x394] ss:$12 sps:$4 sm:$0xff]   ;;  %v302_v63 = vadd.f32 %v2490_v27, %v112_v59  ;;  %v2226_v2 = vld [vmem:[#allocation8 + $0x390] ss:$12 sps:$4 sm:$0xff]  }
 0x153   :  { %1594 = vmatprep.mubr.bf16.mxu1 %v979_v7  ;;  %1512 = vmatprep.mubr.bf16.mxu0 %v979_v7  ;;  %v2229_v7 = vld [vmem:[#allocation8 + $0x458] ss:$12 sps:$4 sm:$0xff]   ;;  %v2234_v27 = vld [vmem:[#allocation8 + $0x3c0] ss:$12 sps:$4 sm:$0xff]  }
 0x155   :  { %1483 = vmatpush1.bf16.msra.mxu0 %v2167_v8  ;;  %1955 = vmatpush3.bf16.msra.mxu1 %v2171_v9  ;;  %v2232_v8 = vld [vmem:[#allocation8 + $0x3ac] ss:$12 sps:$4 sm:$0xff]   ;;  %v311_v9 = vmax.f32 %v302_v63, 0.0 }
 0x156   :  { %1484 = vmatprep.subr.bf16.mxu0 %v2174_v10  ;;  %1956 = vmatprep.subr.bf16.mxu1 %v2175_v11  ;;  %v2233_v10 = vld [vmem:[#allocation8 + $0x470] ss:$12 sps:$4 sm:$0xff]  }
 0x157   :  { %v2236_v11 = vld [vmem:[#allocation8 + $0x3c4] ss:$12 sps:$4 sm:$0xff]  }
 0x159   :  { %1485 = vmatpush1.bf16.msra.mxu0 %v2172_v12  ;;  %1957 = vmatpush3.bf16.msra.mxu1 %v2176_v13  ;;  %v980_v12 = vpack.c.bf16 %v311_v9, %v311_v9  ;;  %v2239_v13 = vld [vmem:[#allocation8 + $0x3dc] ss:$12 sps:$4 sm:$0xff]  }
 0x15a   :  { %1486 = vmatprep.subr.bf16.mxu0 %v2179_v14  ;;  %1958 = vmatprep.subr.bf16.mxu1 %v2180_v15  ;;  %v2237_v14 = vld [vmem:[#allocation8 + $0x3d8] ss:$12 sps:$4 sm:$0xff]   ;;  %v2242_v15 = vld [vmem:[#allocation8 + $0x3f4] ss:$12 sps:$4 sm:$0xff]  }
 0x15d   :  { %1487 = vmatpush1.bf16.msra.mxu0 %v2177_v16  ;;  %1959 = vmatpush3.bf16.msra.mxu1 %v2181_v17  ;;  %v2240_v16 = vld [vmem:[#allocation8 + $0x3f0] ss:$12 sps:$4 sm:$0xff]   ;;  %v2243_v17 = vld [vmem:[#allocation8 + $0x408] ss:$12 sps:$4 sm:$0xff]  }
 0x15e   :  { %1488 = vmatprep.subr.bf16.mxu0 %v2184_v19  ;;  %1960 = vmatprep.subr.bf16.mxu1 %v2185_v20  ;;  %v2248_v19 = vld [vmem:[#allocation8 + $0x424] ss:$12 sps:$4 sm:$0xff]   ;;  %v2246_v20 = vld [vmem:[#allocation8 + $0x420] ss:$12 sps:$4 sm:$0xff]  }
 0x161   :  { %1489 = vmatpush1.bf16.msra.mxu0 %v2182_v21  ;;  %1961 = vmatpush3.bf16.msra.mxu1 %v2186_v22  ;;  %v2251_v21 = vld [vmem:[#allocation8 + $0x43c] ss:$12 sps:$4 sm:$0xff]   ;;  %v2249_v22 = vld [vmem:[#allocation8 + $0x438] ss:$12 sps:$4 sm:$0xff]  }
 0x162   :  { %1490 = vmatprep.subr.bf16.mxu0 %v2189_v24  ;;  %1962 = vmatprep.subr.bf16.mxu1 %v2190_v25  ;;  %v2254_v24 = vld [vmem:[#allocation8 + $0x454] ss:$12 sps:$4 sm:$0xff]   ;;  %v2257_v25 = vld [vmem:[#allocation8 + $0x46c] ss:$12 sps:$4 sm:$0xff]  }
 0x165   :  { %1491 = vmatpush1.bf16.msra.mxu0 %v2187_v26  ;;  %1963 = vmatpush3.bf16.msra.mxu1 %v2191_v28  ;;  %v2255_v26 = vld [vmem:[#allocation8 + $0x468] ss:$12 sps:$4 sm:$0xff]  }
 0x166   :  { %1492 = vmatprep.subr.bf16.mxu0 %v2194_v30  ;;  %1964 = vmatprep.subr.bf16.mxu1 %v2195_v31 }
 0x169   :  { %1493 = vmatpush1.bf16.msra.mxu0 %v2192_v32  ;;  %1965 = vmatpush3.bf16.msra.mxu1 %v2196_v33  ;;  %v1645_v33 = vld [vmem:[%s2582_s4] sm:$0x7]  ;;  %s2387_s4 = smov 1  }
 0x16a   :  { %1494 = vmatprep.subr.bf16.mxu0 %v2199_v35  ;;  %1966 = vmatprep.subr.bf16.mxu1 %v2200_v36  ;;  %v1646_v35 = vunpack.c.l.bf16 %v1645_v33  ;;  %v425_v36 = vrot.slane %v412_v34, %v2499_v39 }
 0x16c   :  { %v1651_v40 = vrot.slane %v1646_v35, %v2477_v4 }
 0x16d   :  { %1495 = vmatpush1.bf16.msra.mxu0 %v2197_v37  ;;  %1967 = vmatpush3.bf16.msra.mxu1 %v2201_v38  ;;  %v1659_v37 = vrot.slane %v1646_v35, %v107_v43  ;;  %v417_v38 = vrot.slane %v412_v34, %v2477_v4 }
 0x16e   :  { %1496 = vmatprep.subr.bf16.mxu0 %v2204_v41  ;;  %2003 = vmatprep.subr.bf16.mxu1 %v2385_v1  ;;  %v421_v41 = vrot.slane %v412_v34, %v2482_v6 }
 0x170   :  { %1595 = vmatmul.mubr.bf16.vlgmr.msra.gmra.mrb[8].mxu1 %v2516_v45 }
 0x171   :  { %1497 = vmatpush1.bf16.msra.mxu0 %v2202_v42  ;;  %2004 = vmatpush3.bf16.msra.mxu1 %v2205_v44  ;;  %v1655_v42 = vrot.slane %v1646_v35, %v2499_v39 }
 0x172   :  { %1498 = vmatprep.subr.bf16.mxu0 %v2208_v18  ;;  %2005 = vmatprep.subr.bf16.mxu1 %v2385_v1 }
 0x173   :  { %2019 = vmatprep.mubr.msk.bf16.mxu1 %vm2386_vm1, %v2385_v1 }
 0x175   :  { %1499 = vmatpush1.bf16.msra.mxu0 %v2206_v46  ;;  %2006 = vmatpush3.bf16.msra.mxu1 %v2209_v47  ;;  %v1666_v47 = vrot.slane %v1651_v40, %v2477_v4 }
 0x176   :  { %1500 = vmatprep.subr.bf16.mxu0 %v2212_v48  ;;  %2007 = vmatprep.subr.bf16.mxu1 %v2385_v1 }
 0x179   :  { %1501 = vmatpush1.bf16.msra.mxu0 %v2210_v49  ;;  %2008 = vmatpush3.bf16.msra.mxu1 %v2213_v50  ;;  %v1674_v49 = vrot.slane %v1659_v37, %v2477_v4 }
 0x17a   :  { %1502 = vmatprep.subr.bf16.mxu0 %v2216_v51  ;;  %2009 = vmatprep.subr.bf16.mxu1 %v2385_v1 }
 0x17d   :  { %1503 = vmatpush1.bf16.msra.mxu0 %v2214_v52  ;;  %2010 = vmatpush3.bf16.msra.mxu1 %v2217_v53  ;;  %v1670_v52 = vrot.slane %v1655_v42, %v2477_v4 }
 0x17e   :  { %1504 = vmatprep.subr.bf16.mxu0 %v2220_v54  ;;  %2011 = vmatprep.subr.bf16.mxu1 %v2385_v1 }
 0x181   :  { %1505 = vmatpush1.bf16.msra.mxu0 %v2218_v56  ;;  %2012 = vmatpush3.bf16.msra.mxu1 %v2221_v57 }
 0x182   :  { %1506 = vmatprep.subr.bf16.mxu0 %v2224_v58  ;;  %2013 = vmatprep.subr.bf16.mxu1 %v2385_v1 }
 0x185   :  { %1507 = vmatpush1.bf16.msra.mxu0 %v2222_v60  ;;  %2014 = vmatpush3.bf16.msra.mxu1 %v2225_v61 }
 0x186   :  { %1508 = vmatprep.subr.bf16.mxu0 %v2228_v62  ;;  %2015 = vmatprep.subr.bf16.mxu1 %v2385_v1 }
 0x189   :  { %1509 = vmatpush1.bf16.msra.mxu0 %v2226_v2  ;;  %2016 = vmatpush3.bf16.msra.mxu1 %v2229_v7 }
 0x18a   :  { %1510 = vmatprep.subr.bf16.mxu0 %v2232_v8  ;;  %2017 = vmatprep.subr.bf16.mxu1 %v2385_v1  ;;  %v2245_v1 = vld [vmem:[#allocation8 + $0x40c] ss:$12 sps:$4 sm:$0xff]  }
 0x18d   :  { %1511 = vmatpush1.bf16.msra.mxu0 %v2230_v5  ;;  %2018 = vmatpush3.bf16.msra.mxu1 %v2233_v10 }
 0x18e   :  { %1521 = vmatprep.subr.bf16.mxu0 %v2236_v11 }
 0x190   :  { %1513 = vmatmul.mubr.bf16.vlgmr.msra.gmra.mrb[16].mxu0 %v2516_v45  ;;  %2020 = vmatmul.mubr.bf16.vlgmr.msra.gmra.mrb[12].mxu1 %v980_v12 }
 0x191   :  { %1522 = vmatpush1.bf16.msra.mxu0 %v2234_v27  ;;  %1553 = vmatprep.mubr.bf16.mxu0 %v2384_v0  ;;  %v2252_v0 = vld [vmem:[#allocation8 + $0x450] ss:$12 sps:$4 sm:$0xff]  }
 0x192   :  { %1523 = vmatprep.subr.bf16.mxu0 %v2239_v13 }
 0x195   :  { %1524 = vmatpush1.bf16.msra.mxu0 %v2237_v14  ;;  %v1079_v14 = vld [vmem:[#allocation7 + $0xd] ss:$4 sm:$0x7] }
 0x196   :  { %1525 = vmatprep.subr.bf16.mxu0 %v2242_v15  ;;  %v1092_v15 = vrot.slane %v1079_v14, %v2499_v39  ;;  %v1699_v39 = vrot.slane %v1646_v35, %v103_v23 }
 0x198   :  { %v1714_v34 = vrot.slane %v1699_v39, %v2482_v6 }
 0x199   :  { %1526 = vmatpush1.bf16.msra.mxu0 %v2240_v16  ;;  %v1703_v16 = vrot.slane %v1646_v35, %v111_v55 }
 0x19a   :  { %1527 = vmatprep.subr.bf16.mxu0 %v2245_v1 }
 0x19d   :  { %1528 = vmatpush1.bf16.msra.mxu0 %v2243_v17 }
 0x19e   :  { %1529 = vmatprep.subr.bf16.mxu0 %v2248_v19 }
 0x1a1   :  { %1530 = vmatpush1.bf16.msra.mxu0 %v2246_v20 }
 0x1a2   :  { %1531 = vmatprep.subr.bf16.mxu0 %v2251_v21  ;;  %v1718_v21 = vrot.slane %v1703_v16, %v2482_v6 }
 0x1a5   :  { %1532 = vmatpush1.bf16.msra.mxu0 %v2249_v22 }
 0x1a6   :  { %1533 = vmatprep.subr.bf16.mxu0 %v2254_v24 }
 0x1a9   :  { %1534 = vmatpush1.bf16.msra.mxu0 %v2252_v0 }
 0x1aa   :  { %1535 = vmatprep.subr.bf16.mxu0 %v2257_v25 }
 0x1ad   :  { %1536 = vmatpush1.bf16.msra.mxu0 %v2255_v26  ;;  %v1084_v26 = vrot.slane %v1079_v14, %v2477_v4 }
 0x1b0   :  { %1554 = vmatmul.mubr.bf16.vlgmr.msra.gmra.mrb[16].mxu0 %v980_v12 }
 0x203   :  { %v1937_v28 = vpop.f32.mrb[8].mxu0 }
 0x204   :  { %v1938_v29 = vpop.f32.mrb[9].mxu0 }
 0x205   :  { %v1939_v30 = vadd.f32 %v1938_v29, %v1937_v28  ;;  %v1940_v31 = vpop.f32.mrb[10].mxu0  ;;  %v1695_v28 = vrot.slane %v1646_v35, %v2482_v6  ;;  %v1088_v29 = vrot.slane %v1079_v14, %v2482_v6 }
 0x206   :  { %v1941_v32 = vpop.f32.mrb[11].mxu0 }
 0x207   :  { %v930_v44 = vadd.f32 %v1939_v30, %v425_v36  ;;  %v1710_v31 = vrot.slane %v1695_v28, %v2482_v6  ;;  %v1919_v6 = vld [vmem:[#allocation7 + $0x2] ss:$0 sm:$0xff] }
 0x223   :  { %v888_v45 = vpop.f32.mrb[4].mxu1  ;;  %v969_v18 = vpop.f32.mrb[12].mxu0 }
 0x224   :  { %v2023_v46 = vadd.f32 %v888_v45, %v417_v38  ;;  %v970_v48 = vadd.f32 %v969_v18, %v930_v44  ;;  %v890_v50 = vpop.f32.mrb[5].mxu1  ;;  %v2001_v51 = vpop.f32.mrb[13].mxu0  ;;  %v1920_v45 = vld [vmem:[#allocation7 + $0xe] ss:$0 sm:$0xff] }
 0x225   :  { %v2024_v43 = vadd.f32 %v890_v50, %v421_v41  ;;  %v892_v53 = vpop.f32.mrb[6].mxu1  ;;  %v972_v54 = vpop.f32.mrb[14].mxu0 }
 0x226   :  { %v975_v56 = vmax.f32 %v2023_v46, 0.0  ;;  %v977_v57 = vmax.f32 %v970_v48, 0.0  ;;  %v893_v58 = vpop.f32.mrb[7].mxu1  ;;  %v2002_v59 = vpop.f32.mrb[15].mxu0 }
 0x227   :  { %v976_v60 = vmax.f32 %v2024_v43, 0.0 }
 0x228   :  { %v1675_v61 = vmul.f32 %v1666_v47, %v975_v56  ;;  %v1677_v62 = vmul.f32 %v1674_v49, %v977_v57 }
 0x229   :  { %v1676_v63 = vmul.f32 %v1670_v52, %v976_v60 }
 0x22a   :  { %v1679_v2 = vsel %vm1678_vm2, %v1675_v61, 0.0  ;;  %v1682_v9 = vsel %vm1678_vm2, %v1677_v62, 0.0 }
 0x22b   :  { %v1680_v7 = vsel %vm1678_vm2, %v1676_v63, 0.0 }
 0x22c   :  { %v1681_v8 = vadd.f32 %v1680_v7, %v1679_v2 }
 0x22e   :  { %v1683_v5 = vadd.f32 %v1682_v9, %v1681_v8 }
 0x243   :  { %v1968_v10 = vpop.f32.mrb[8].mxu1 }
 0x244   :  { %v1969_v11 = vpop.f32.mrb[9].mxu1 }
 0x245   :  { %v1970_v12 = vadd.f32 %v1969_v11, %v1968_v10  ;;  %v1971_v27 = vpop.f32.mrb[10].mxu1 }
 0x246   :  { %v1972_v13 = vpop.f32.mrb[11].mxu1 }
 0x247   :  { %v1597_v1 = vadd.f32 %v1970_v12, %v1092_v15 }
 0x263   :  { %v1636_v17 = vpop.f32.mrb[12].mxu1 }
 0x264   :  { %v1637_v19 = vadd.f32 %v1636_v17, %v1597_v1  ;;  %v2021_v20 = vpop.f32.mrb[13].mxu1 }
 0x265   :  { %v1639_v22 = vpop.f32.mrb[14].mxu1 }
 0x266   :  { %v1644_v24 = vmax.f32 %v1637_v19, 0.0  ;;  %v2022_v0 = vpop.f32.mrb[15].mxu1 }
 0x268   :  { %v1721_v25 = vmul.f32 %v1718_v21, %v1644_v24 }
 0x26a   :  { %v1725_v35 = vsel %vm1678_vm2, %v1721_v25, 0.0 }
 0x283   :  { %v1555_v55 = vpop.f32.mrb[16].mxu0 }
 0x284   :  { %v2025_v30 = vadd.f32 %v1555_v55, %v1084_v26  ;;  %v1557_v32 = vpop.f32.mrb[17].mxu0 }
 0x285   :  { %v2026_v33 = vadd.f32 %v1557_v32, %v1088_v29  ;;  %v1559_v36 = vpop.f32.mrb[18].mxu0 }
 0x286   :  { %v1642_v37 = vmax.f32 %v2025_v30, 0.0  ;;  %v1560_v38 = vpop.f32.mrb[19].mxu0 }
 0x287   :  { %v1643_v40 = vmax.f32 %v2026_v33, 0.0 }
 0x288   :  { %v1719_v4 = vmul.f32 %v1710_v31, %v1642_v37 }
 0x289   :  { %v1720_v41 = vmul.f32 %v1714_v34, %v1643_v40 }
 0x28a   :  { %v1722_v42 = vsel %vm1678_vm2, %v1719_v4, 0.0 }
 0x28b   :  { %v1723_v3 = vsel %vm1678_vm2, %v1720_v41, 0.0 }
 0x28c   :  { %v1724_v23 = vadd.f32 %v1723_v3, %v1722_v42 }
 0x28e   :  { %v1726_v44 = vadd.f32 %v1725_v35, %v1724_v23 }
 0x290   :  { %1727 = vadd.xlane.f32.xlu0 %v1726_v44 }
 0x294   :  { %1684 = vadd.xlane.f32.xlu0 %v1683_v5 }
 0x31d   :  { %v1728_v18 = vpop.xlane.xlu0 %1727 }
 0x31e   :  { %v1734_v46 = vadd.f32 %v1920_v45, %v1728_v18 }
 0x320   :  { %1736 = vrot.lane.b32.xlu1 %v1734_v46, %s2387_s4 }
 0x321   :  { %v1685_v47 = vpop.xlane.xlu0 %1684 }
 0x322   :  { %v1691_v48 = vadd.f32 %v1919_v6, %v1685_v47 }
 0x392   :  { %v1737_v49 = vpop.permute.xlu1 %1736 }
 0x393   :  { %v1740_v50 = vsel %vm1739_vm3, %v1691_v48, %v1737_v49 }
 0x394   :  { %1742 = vst.msk [vmem:[#allocation10] sm:$0x3] %vm1741_vm4, %v1740_v50 }
 0x395   :  { %2357 = shalt.err (!%p2354_p8)
}
 0x396   :  { %s2358_s22 = scalar_lea.hbm %s2583_s5, 32 }
 0x397   :  { %p2359_p9 = scmp.ne.s32.totalorder %s2583_s5, %s2358_s22  ;;  %p2362_p10 = scmp.lt.u32.totalorder %s2358_s22, %s2583_s5 }
 0x399   :  { %p2364_p11 = pnand %p2362_p10, %p2359_p9 }
 0x39b   :  { %2367 = shalt.err (!%p2364_p11)
}
 0x39c   :  { %1752 = dma.vmem_to_hbm [thread:$0]  %s1750_s18, 32, %s2583_s5, [#allocation4]  }
 0x39d   :  { %2374 = dma.done.wait [#allocation4], 32  }
 0x39e   :  { %2375 = vsyncadd [#allocation4], 4294967264 }
 0x39f   :  { %1756 = vsyncpa [#allocation3], 1 }
 0x3a0   :  { %1757 = vsyncpa [#allocation6], 1 }
 0x3a1   :  { %1758 = vsyncpa [#allocation9], 1 }
 0x3a2   :  { %1759 = vsyncpa [#allocation4], 1 }

</bundles_post_ra>
